<compile_context>
chip_gen: v7x
topology: tpu7x:2x2x1
jax: 0.10.0
libtpu: 0.0.40
codegen_flags: <defaults>
</compile_context>

<pallas_src>
import jax
import jax.numpy as jnp
from jax.experimental import pallas as pl
from jax.experimental.pallas import tpu as pltpu

# ---- config mirroring `opt` ----
ANG_RES = 4          # opt.angResolution (u == v)
CHANNEL_NUM = 1      # opt.channelNum   (forward's reshape requires c == 1)
MEASUREMENT_NUM = 2  # opt.measurementNum
STAGE_NUM = 2        # opt.stageNum
HIDDEN = 32          # hidden width of the synthetic RefNet stand-in

K_FEAT = CHANNEL_NUM * ANG_RES * ANG_RES     # 16, (c,u,v) flattened
UV_FEAT = ANG_RES * ANG_RES * CHANNEL_NUM    # 16, (u,v,c) flattened (== K_FEAT for c==1)


def mainnet_kernel(lf_ref, wiT_ref, w2iT_ref, wsT_ref, w2sT_ref, out_ref):
    """Fused MainNet forward for one (batch, spatial-tile) block.

    Transposed, lane-dense layout (spatial positions on the 128-lane axis):
      lf_ref  : (1, K, TS)   input dtype  light-field rows = (u,v,c) angular features
      wiT_ref : (H, K)       bf16  (wpT @ w1_init).T   -- proj_init folded in
      w2iT_ref: (UV, H)      bf16  w2_init.T
      wsT_ref : (S, H, K)    bf16  per-stage (wpT @ w1_stage).T
      w2sT_ref: (S, UV, H)   bf16  per-stage w2_stage.T
      out_ref : (1, UV, TS)  out dtype (bf16 default)  reconstructed light field
    """
    xf = lf_ref[0].astype(jnp.float32)                  # (K, TS) f32 residual base
    xb = xf.astype(jnp.bfloat16)                        # (K, TS) bf16 MXU operand

    # initLF = initialRefnet(proj_init(lf));  proj_init is folded into wiT.
    h = jnp.maximum(
        jnp.dot(wiT_ref[...], xb, preferred_element_type=jnp.float32), 0.0)     # (H, TS)
    out = jnp.dot(w2iT_ref[...], h.astype(jnp.bfloat16),
                  preferred_element_type=jnp.float32)                           # (UV, TS)

    # iterative stages:  out += refnet_s(degLF - proj_init(out))
    # with proj_init folded:  out += w2s^T @ relu(Ws^T @ (lf - out))
    # (K == UV and the row orderings coincide for c == 1.)
    for s in range(STAGE_NUM):
        # NOTE: residual is computed in f32 and only rounded to bf16 for the MXU
        # operand; the absolute rounding error scales with the (small) residual.
        r = (xf - out).astype(jnp.bfloat16)                                      # (K, TS)
        h = jnp.maximum(
            jnp.dot(wsT_ref[s], r, preferred_element_type=jnp.float32), 0.0)     # (H, TS)
        out = out + jnp.dot(w2sT_ref[s], h.astype(jnp.bfloat16),
                            preferred_element_type=jnp.float32)                  # (UV, TS)

    out_ref[0] = out.astype(out_ref.dtype)


def _round_up(n, m):
    return ((n + m - 1) // m) * m


def _pick_tile(s128, tile_cap, batch):
    """Largest 128-multiple tile that (a) divides the 128-padded spatial extent,
    (b) is <= tile_cap, and (c) keeps total grid points >= 2 when possible
    (so both v7x TensorCores get work)."""
    n_chunks = s128 // 128
    cands = [d for d in range(1, n_chunks + 1)
             if n_chunks % d == 0 and 128 * d <= tile_cap]
    multi = [d for d in cands if batch * (n_chunks // d) >= 2]
    return 128 * max(multi if multi else cands)


def xavier_uniform(key, shape, fan_in, fan_out):
    limit = (6.0 / (fan_in + fan_out)) ** 0.5
    return jax.random.uniform(key, shape, jnp.float32, -limit, limit)


def init_params(key):
    """Raw (un-fused, f32) parameters mirroring the PyTorch module."""
    u = v = ANG_RES
    c = CHANNEL_NUM
    m = MEASUREMENT_NUM
    K = c * u * v
    UV = u * v * c
    ks = jax.random.split(key, 3 + 2 * STAGE_NUM)

    # proj_init: Conv2d(c -> m, kernel (u, v), bias=False), xavier_uniform
    wp = xavier_uniform(ks[0], (m, c, u, v), fan_in=c * u * v, fan_out=m * u * v)
    wpT = wp.reshape(m, K).T                                   # (K, M), (c,u,v) flatten

    # initial RefNet stand-in
    w1i = xavier_uniform(ks[1], (m * c, HIDDEN), m * c, HIDDEN)
    w2i = xavier_uniform(ks[2], (HIDDEN, UV), HIDDEN, UV)

    # per-stage RefNet stand-ins (independent weights per stage, like CascadeStages)
    w1s = jnp.stack([xavier_uniform(ks[3 + 2 * s], (m * c, HIDDEN), m * c, HIDDEN)
                     for s in range(STAGE_NUM)])               # (S, M, H)
    w2s = jnp.stack([xavier_uniform(ks[4 + 2 * s], (HIDDEN, UV), HIDDEN, UV)
                     for s in range(STAGE_NUM)])               # (S, H, UV)
    return dict(wpT=wpT, w1i=w1i, w2i=w2i, w1s=w1s, w2s=w2s)


def fuse_params(raw, dtype=jnp.bfloat16):
    """Fold proj_init into the RefNet first layers and transpose for the lane-dense layout."""
    wpT = raw["wpT"]                                                  # (K, M)
    wiT = (wpT @ raw["w1i"]).T                                        # (H, K)
    w2iT = raw["w2i"].T                                               # (UV, H)
    wsT = jnp.stack([(wpT @ raw["w1s"][s]).T for s in range(STAGE_NUM)])   # (S, H, K)
    w2sT = jnp.stack([raw["w2s"][s].T for s in range(STAGE_NUM)])          # (S, UV, H)
    return dict(wiT=wiT.astype(dtype), w2iT=w2iT.astype(dtype),
                wsT=wsT.astype(dtype), w2sT=w2sT.astype(dtype))


def mainnet_forward(lf, kparams, epoch=0, tile_s=8192, out_dtype=jnp.bfloat16):
    # `epoch` is threaded through in PyTorch but unused by the computation here.
    b, u, v, c, x, y = lf.shape
    assert c == CHANNEL_NUM and u == ANG_RES and v == ANG_RES
    K = u * v * c
    UV = u * v * c
    S = x * y

    # Native layout: (b,u,v,c,x,y) collapses (zero-copy) to (b, K, S) with spatial
    # positions on the lane (minor) axis -- no transposes or dtype casts in the wrapper;
    # the kernel casts in-register.
    lf_r = lf.reshape(b, K, S)

    # Pad only to the 128-lane boundary (usually a no-op), never to a tile multiple.
    # Padded lanes stay finite/negligible (stand-in RefNet has no biases) and are sliced
    # off below -- never alias / accumulate them downstream.
    s128 = _round_up(S, 128)
    if s128 != S:
        lf_r = jnp.pad(lf_r, ((0, 0), (0, 0), (0, s128 - S)))

    # Tile: largest 128-multiple divisor of the padded extent under the cap; keeps
    # >= 2 total grid points whenever possible (v7x has 2 TensorCores).
    tile_cap = max(128, (int(tile_s) // 128) * 128)
    tile = _pick_tile(s128, tile_cap, b)
    n_tiles = s128 // tile
    grid = (b, n_tiles)

    # Generous VMEM budget derived from the tile so large tile_s never trips the
    # default scoped limit (16 MiB on v5e); stays well under v7x's 64 MiB physical.
    in_bytes = jnp.dtype(lf_r.dtype).itemsize
    out_bytes = jnp.dtype(out_dtype).itemsize
    vmem_est = (2 * K * tile * in_bytes            # double-buffered input blocks
                + 2 * UV * tile * out_bytes        # double-buffered output blocks
                + tile * (HIDDEN + 3 * K + UV) * 4  # f32 intermediates (xf, r, h, out)
                + (1 << 20))                        # weights + headroom
    vmem_limit = max(int(vmem_est), 16 * 1024 * 1024)

    out_r = pl.pallas_call(
        mainnet_kernel,
        out_shape=jax.ShapeDtypeStruct((b, UV, s128), out_dtype),
        grid_spec=pltpu.PrefetchScalarGridSpec(
            num_scalar_prefetch=0,
            grid=grid,
            in_specs=[
                pl.BlockSpec((1, K, tile), lambda bi, si: (bi, 0, si)),       # lf tile
                pl.BlockSpec((HIDDEN, K), lambda bi, si: (0, 0)),             # fused init w1
                pl.BlockSpec((UV, HIDDEN), lambda bi, si: (0, 0)),            # init w2
                pl.BlockSpec((STAGE_NUM, HIDDEN, K), lambda bi, si: (0, 0, 0)),
                pl.BlockSpec((STAGE_NUM, UV, HIDDEN), lambda bi, si: (0, 0, 0)),
            ],
            out_specs=pl.BlockSpec((1, UV, tile), lambda bi, si: (bi, 0, si)),
        ),
        compiler_params=pltpu.CompilerParams(
            dimension_semantics=("parallel", "parallel"),
            vmem_limit_bytes=vmem_limit,
        ),
    )(lf_r, kparams["wiT"], kparams["w2iT"], kparams["wsT"], kparams["w2sT"])

    if s128 != S:
        out_r = out_r[:, :, :S]
    return out_r.reshape(b, u, v, c, x, y)


def mainnet_reference(lf, raw):
    """Pure-JAX f32 reference with the original (un-fused, un-transposed) structure."""
    b, u, v, c, x, y = lf.shape
    K = c * u * v
    N = b * x * y
    xf = jnp.transpose(lf, (0, 4, 5, 3, 1, 2)).reshape(N, K)
    wpT = raw["wpT"]
    deg = xf @ wpT                                   # proj_init

    def refnet(inp, w1, w2):
        return jnp.maximum(inp @ w1, 0.0) @ w2

    out = refnet(deg, raw["w1i"], raw["w2i"])        # initialRefnet
    for s in range(STAGE_NUM):
        proj = out @ wpT                             # (u,v,c) == (c,u,v) for c == 1
        out = out + refnet(deg - proj, raw["w1s"][s], raw["w2s"][s])
    out = out.reshape(b, x, y, u, v, c)
    return jnp.transpose(out, (0, 3, 4, 5, 1, 2))


if __name__ == "__main__":
    key = jax.random.PRNGKey(0)
    k_lf, k_params = jax.random.split(key)

    b, x, y = 2, 16, 16
    lf = jax.random.normal(
        k_lf, (b, ANG_RES, ANG_RES, CHANNEL_NUM, x, y), dtype=jnp.float32)

    raw = init_params(k_params)
    kparams = fuse_params(raw)

    out = mainnet_forward(lf, kparams, epoch=0)
    out = jax.block_until_ready(out)

    assert out.shape == lf.shape, (out.shape, lf.shape)
    out_f32 = out.astype(jnp.float32)
    assert jnp.all(jnp.isfinite(out_f32))

    # Sanity check against the un-fused f32 reference (loose tolerance: bf16 operands
    # and bf16 output store).
    ref = mainnet_reference(lf, raw)
    max_err = float(jnp.max(jnp.abs(out_f32 - ref)))
    assert max_err < 1e-1, f"max abs error vs reference: {max_err}"

    print("KERNEL_OK")
</pallas_src>

<mosaic_0001>
module attributes {stable_mosaic.version = 11 : i64} {
  func.func @mainnet_kernel(%arg0: i32, %arg1: i32, %arg2: memref<1x16x256xf32, #tpu.memory_space<vmem>>, %arg3: memref<32x16xbf16, #tpu.memory_space<vmem>>, %arg4: memref<16x32xbf16, #tpu.memory_space<vmem>>, %arg5: memref<2x32x16xbf16, #tpu.memory_space<vmem>>, %arg6: memref<2x16x32xbf16, #tpu.memory_space<vmem>>, %arg7: memref<1x16x256xbf16, #tpu.memory_space<vmem>>) attributes {dimension_semantics = [#tpu.dimension_semantics<parallel>, #tpu.dimension_semantics<parallel>], iteration_bounds = array<i64: 2, 1>, scalar_prefetch = 0 : i64, scratch_operands = 0 : i64, tpu.core_type = #tpu.core_type<tc>, window_params = [{transform_indices = @transform_0, window_bounds = array<i64: 1, 16, 256>}, {pipeline_mode = #tpu.pipeline_mode<synchronous>, transform_indices = @transform_1, window_bounds = array<i64: 32, 16>}, {pipeline_mode = #tpu.pipeline_mode<synchronous>, transform_indices = @transform_2, window_bounds = array<i64: 16, 32>}, {pipeline_mode = #tpu.pipeline_mode<synchronous>, transform_indices = @transform_3, window_bounds = array<i64: 2, 32, 16>}, {pipeline_mode = #tpu.pipeline_mode<synchronous>, transform_indices = @transform_4, window_bounds = array<i64: 2, 16, 32>}, {transform_indices = @transform_5, window_bounds = array<i64: 1, 16, 256>}]} {
    %c0 = arith.constant 0 : index
    %c0_0 = arith.constant 0 : index
    %c0_1 = arith.constant 0 : index
    %0 = vector.load %arg2[%c0, %c0_0, %c0_1] : memref<1x16x256xf32, #tpu.memory_space<vmem>>, vector<1x16x256xf32>
    %1 = vector.shape_cast %0 : vector<1x16x256xf32> to vector<16x256xf32>
    %2 = arith.truncf %1 : vector<16x256xf32> to vector<16x256xbf16>
    %c0_2 = arith.constant 0 : index
    %c0_3 = arith.constant 0 : index
    %3 = vector.load %arg3[%c0_2, %c0_3] : memref<32x16xbf16, #tpu.memory_space<vmem>>, vector<32x16xbf16>
    %cst = arith.constant dense<0.000000e+00> : vector<32x256xf32>
    %4 = tpu.matmul %3, %2, %cst {dimension_numbers = #tpu.dot_dimension_numbers<[1], [0], [0], [1], [0, 0, 1, 1], [], []>} : vector<32x16xbf16>, vector<16x256xbf16>, vector<32x256xf32> -> vector<32x256xf32>
    %cst_4 = arith.constant 0.000000e+00 : f32
    %5 = vector.broadcast %cst_4 : f32 to vector<32x256xf32>
    %6 = arith.maximumf %4, %5 : vector<32x256xf32>
    %c0_5 = arith.constant 0 : index
    %c0_6 = arith.constant 0 : index
    %7 = vector.load %arg4[%c0_5, %c0_6] : memref<16x32xbf16, #tpu.memory_space<vmem>>, vector<16x32xbf16>
    %8 = arith.truncf %6 : vector<32x256xf32> to vector<32x256xbf16>
    %cst_7 = arith.constant dense<0.000000e+00> : vector<16x256xf32>
    %9 = tpu.matmul %7, %8, %cst_7 {dimension_numbers = #tpu.dot_dimension_numbers<[1], [0], [0], [1], [0, 0, 1, 1], [], []>} : vector<16x32xbf16>, vector<32x256xbf16>, vector<16x256xf32> -> vector<16x256xf32>
    %10 = arith.subf %1, %9 : vector<16x256xf32>
    %11 = arith.truncf %10 : vector<16x256xf32> to vector<16x256xbf16>
    %c0_8 = arith.constant 0 : index
    %c0_9 = arith.constant 0 : index
    %c0_10 = arith.constant 0 : index
    %12 = vector.load %arg5[%c0_8, %c0_9, %c0_10] : memref<2x32x16xbf16, #tpu.memory_space<vmem>>, vector<1x32x16xbf16>
    %13 = vector.shape_cast %12 : vector<1x32x16xbf16> to vector<32x16xbf16>
    %cst_11 = arith.constant dense<0.000000e+00> : vector<32x256xf32>
    %14 = tpu.matmul %13, %11, %cst_11 {dimension_numbers = #tpu.dot_dimension_numbers<[1], [0], [0], [1], [0, 0, 1, 1], [], []>} : vector<32x16xbf16>, vector<16x256xbf16>, vector<32x256xf32> -> vector<32x256xf32>
    %cst_12 = arith.constant 0.000000e+00 : f32
    %15 = vector.broadcast %cst_12 : f32 to vector<32x256xf32>
    %16 = arith.maximumf %14, %15 : vector<32x256xf32>
    %c0_13 = arith.constant 0 : index
    %c0_14 = arith.constant 0 : index
    %c0_15 = arith.constant 0 : index
    %17 = vector.load %arg6[%c0_13, %c0_14, %c0_15] : memref<2x16x32xbf16, #tpu.memory_space<vmem>>, vector<1x16x32xbf16>
    %18 = vector.shape_cast %17 : vector<1x16x32xbf16> to vector<16x32xbf16>
    %19 = arith.truncf %16 : vector<32x256xf32> to vector<32x256xbf16>
    %cst_16 = arith.constant dense<0.000000e+00> : vector<16x256xf32>
    %20 = tpu.matmul %18, %19, %cst_16 {dimension_numbers = #tpu.dot_dimension_numbers<[1], [0], [0], [1], [0, 0, 1, 1], [], []>} : vector<16x32xbf16>, vector<32x256xbf16>, vector<16x256xf32> -> vector<16x256xf32>
    %21 = arith.addf %9, %20 : vector<16x256xf32>
    %22 = arith.subf %1, %21 : vector<16x256xf32>
    %23 = arith.truncf %22 : vector<16x256xf32> to vector<16x256xbf16>
    %c1 = arith.constant 1 : index
    %c0_17 = arith.constant 0 : index
    %c0_18 = arith.constant 0 : index
    %24 = vector.load %arg5[%c1, %c0_17, %c0_18] : memref<2x32x16xbf16, #tpu.memory_space<vmem>>, vector<1x32x16xbf16>
    %25 = vector.shape_cast %24 : vector<1x32x16xbf16> to vector<32x16xbf16>
    %cst_19 = arith.constant dense<0.000000e+00> : vector<32x256xf32>
    %26 = tpu.matmul %25, %23, %cst_19 {dimension_numbers = #tpu.dot_dimension_numbers<[1], [0], [0], [1], [0, 0, 1, 1], [], []>} : vector<32x16xbf16>, vector<16x256xbf16>, vector<32x256xf32> -> vector<32x256xf32>
    %cst_20 = arith.constant 0.000000e+00 : f32
    %27 = vector.broadcast %cst_20 : f32 to vector<32x256xf32>
    %28 = arith.maximumf %26, %27 : vector<32x256xf32>
    %c1_21 = arith.constant 1 : index
    %c0_22 = arith.constant 0 : index
    %c0_23 = arith.constant 0 : index
    %29 = vector.load %arg6[%c1_21, %c0_22, %c0_23] : memref<2x16x32xbf16, #tpu.memory_space<vmem>>, vector<1x16x32xbf16>
    %30 = vector.shape_cast %29 : vector<1x16x32xbf16> to vector<16x32xbf16>
    %31 = arith.truncf %28 : vector<32x256xf32> to vector<32x256xbf16>
    %cst_24 = arith.constant dense<0.000000e+00> : vector<16x256xf32>
    %32 = tpu.matmul %30, %31, %cst_24 {dimension_numbers = #tpu.dot_dimension_numbers<[1], [0], [0], [1], [0, 0, 1, 1], [], []>} : vector<16x32xbf16>, vector<32x256xbf16>, vector<16x256xf32> -> vector<16x256xf32>
    %33 = arith.addf %21, %32 : vector<16x256xf32>
    %34 = arith.truncf %33 : vector<16x256xf32> to vector<16x256xbf16>
    %c0_25 = arith.constant 0 : index
    %c0_26 = arith.constant 0 : index
    %c0_27 = arith.constant 0 : index
    %35 = vector.load %arg7[%c0_25, %c0_26, %c0_27] : memref<1x16x256xbf16, #tpu.memory_space<vmem>>, vector<1x16x256xbf16>
    %36 = vector.shape_cast %35 : vector<1x16x256xbf16> to vector<16x256xbf16>
    %37 = vector.shape_cast %34 : vector<16x256xbf16> to vector<1x16x256xbf16>
    tpu.vector_store %arg7[%c0_25, %c0_26, %c0_27], %37 {strides = array<i32>} : memref<1x16x256xbf16, #tpu.memory_space<vmem>>, vector<1x16x256xbf16>,
    return
  }
  func.func @transform_0(%arg0: i32, %arg1: i32) -> (i32, i32, i32) {
    %c0_i32 = arith.constant 0 : i32
    %c0_i32_0 = arith.constant 0 : i32
    return %arg0, %c0_i32, %arg1 : i32, i32, i32
  }
  func.func @transform_1(%arg0: i32, %arg1: i32) -> (i32, i32) {
    %c0_i32 = arith.constant 0 : i32
    %c0_i32_0 = arith.constant 0 : i32
    %c0_i32_1 = arith.constant 0 : i32
    return %c0_i32, %c0_i32_0 : i32, i32
  }
  func.func @transform_2(%arg0: i32, %arg1: i32) -> (i32, i32) {
    %c0_i32 = arith.constant 0 : i32
    %c0_i32_0 = arith.constant 0 : i32
    %c0_i32_1 = arith.constant 0 : i32
    return %c0_i32, %c0_i32_0 : i32, i32
  }
  func.func @transform_3(%arg0: i32, %arg1: i32) -> (i32, i32, i32) {
    %c0_i32 = arith.constant 0 : i32
    %c0_i32_0 = arith.constant 0 : i32
    %c0_i32_1 = arith.constant 0 : i32
    %c0_i32_2 = arith.constant 0 : i32
    return %c0_i32, %c0_i32_0, %c0_i32_1 : i32, i32, i32
  }
  func.func @transform_4(%arg0: i32, %arg1: i32) -> (i32, i32, i32) {
    %c0_i32 = arith.constant 0 : i32
    %c0_i32_0 = arith.constant 0 : i32
    %c0_i32_1 = arith.constant 0 : i32
    %c0_i32_2 = arith.constant 0 : i32
    return %c0_i32, %c0_i32_0, %c0_i32_1 : i32, i32, i32
  }
  func.func @transform_5(%arg0: i32, %arg1: i32) -> (i32, i32, i32) {
    %c0_i32 = arith.constant 0 : i32
    %c0_i32_0 = arith.constant 0 : i32
    return %arg0, %c0_i32, %arg1 : i32, i32, i32
  }
}

</mosaic_0001>

<bundles_post_ra>
// kernel: tpu_custom_call.1
= control target key start
LH: loop header
LB: loop body
LE: loop exit
PB: predicated region body
PF: predicated region fallthrough
CT: control target
= control target key end

     0   :  { %10 = vsyncpa [#allocation3], 0  ;;  %s1423_s0 = inlined_call_operand.vmem [shape: f32[2,16,256], index: 0, kind: input, shape index: {}]   ;;  %s1424_s1 = inlined_call_operand.vmem [shape: bf16[32,16], index: 1, kind: input, shape index: {}]   ;;  %s1425_s2 = inlined_call_operand.hbm [shape: bf16[16,32], index: 2, kind: input, shape index: {}]   ;;  %s1426_s3 = inlined_call_operand.vmem [shape: bf16[2,32,16], index: 3, kind: input, shape index: {}]   ;;  %s1427_s4 = inlined_call_operand.hbm [shape: bf16[2,16,32], index: 4, kind: input, shape index: {}]   ;;  %s1428_s5 = inlined_call_operand.hbm [shape: bf16[2,16,256], index: 5, kind: output, shape index: {}]  }
   0x1   :  { %11 = vsyncpa [#allocation6], 0 }
   0x2   :  { %12 = vsyncpa [#allocation4], 0 }
   0x3   :  { %14 = vsyncpa [#allocation4 + $0x1], 0  ;;  %s1177_s18 = smov 0   ;;  %s1179_s19 = smov 0  }
   0x4   :  { %s1181_s20 = smov 0   ;;  %s1183_s21 = smov 0  }
   0x5   :  { %s1185_s22 = smov 0   ;;  %s1187_s23 = smov 0  }
   0x6 LB: > { %s860_s24 = sadd.s32 4294967295, %s1137_s23   ;;  %s861_s25 = sadd.s32 4294967294, %s1137_s23   ;;  %s1137_s23 = sphi %s1187_s23, %s20_s23   ;;  %s1133_s22 = sphi %s1185_s22, %s1449_s22   ;;  %s1129_s21 = sphi %s1183_s21, %s1448_s21   ;;  %s1125_s20 = sphi %s1181_s20, %s1447_s20   ;;  %s1121_s19 = sphi %s1179_s19, %s1446_s19   ;;  %s1117_s18 = sphi %s1177_s18, %s1445_s18  }
   0x7   : > { %s32_s26 = sadd.s32 1, %s1133_s22  ;;  %s153_s27 = sadd.s32 1, %s1125_s20 }
   0x8   : > { %p34_p0 = scmp.ge.s32.totalorder %s32_s26, 2  ;;  %p163_p1 = scmp.ne.s32.totalorder %s1125_s20, %s1121_s19 }
   0x9   : > { %p164_p2 = scmp.eq.s32.totalorder %s860_s24, 1  ;;  %p169_p3 = scmp.ne.s32.totalorder %s1121_s19, %s1117_s18 }
   0xa   : > { %s1451_s26 = smov (%p34_p0, %s32_s26), 0  ;;  %p170_p5 = scmp.eq.s32.totalorder %s861_s25, 1 }
   0xb   : > { %1434 = sst [smem:[#allocation11_spill]] %s1451_s26  ;;  %p1217_p4 = por %p164_p2, %p163_p1 }
   0xc   : > { %s148_s29 = ssub.s32 %s1133_s22, %s1451_s26  ;;  %p862_p6 = scmp.ge.s32.totalorder %s1137_s23, 1 }
   0xd   : > { %s1435_s28 = scalar_select %p1217_p4, 1, 0 }
   0xe   : > { %p151_p7 = scmp.eq.s32.totalorder %s148_s29, 0  ;;  %p1224_p8 = por %p170_p5, %p169_p3 }
   0xf   : > { %p177_p9 = scmp.lt.s32.totalorder %s1137_s23, 3  ;;  %p1236_p11 = scmp.eq.s32.totalorder %s860_s24, 0 }
  0x10   : > { %s1436_s30 = scalar_select %p1224_p8, 1, 0 }
  0x11   : > { %s1230_s6 = scalar_select %p151_p7, %s1125_s20, %s153_s27  }
  0x12   : > { %p1232_p10 = pnand %p862_p6, %p177_p9  ;;  %s1139_s9 = smov [#allocation2]  }
  0x13   : > { %s1438_s8 = scalar_select %p1236_p11, 1, 0 }
  0x14   : > { %s1437_s7 = scalar_select %p1232_p10, 1, 0 }
  0x15   : > { %p915_p12 = pneg %p1232_p10  ;;  %s192_s10 = sshll.u32 %s1139_s9, 4  ;;  %s193_s10 = int_to_ptr.vmem [resolvable:$true] %s192_s10 }
  0x16   : > { %s1140_s12 = smov [#allocation5]   ;;  %s995_s16 = scalar_lea.hbm %s1425_s2, 128 }
  0x17   : > { %p1244_p13 = pnand %p1236_p11, %p915_p12  ;;  %s208_s13 = sshll.u32 %s1140_s12, 4  ;;  %s1248_s13 = int_to_ptr.vmem [resolvable:$true] %s208_s13 }
  0x18   : > { %p996_p0 = scmp.ne.s32.totalorder %s1425_s2, %s995_s16  ;;  %p1002_p5 = scmp.lt.u32.totalorder %s995_s16, %s1425_s2 }
  0x19   : > { %p997_p1 = pneg %p1244_p13 }
  0x1b   : > { %p998_p2 = pnand %p997_p1, %p996_p0 }
  0x1d   : > { %p999_p3 = pneg %p998_p2 }
  0x1f   : > { %p1004_p6 = pnand %p1002_p5, %p999_p3 }
  0x21   : > { %1007 = shalt.err (!%p1004_p6)
}
  0x22   : > { %s1008_s29 = scalar_lea.vmem %s193_s10, 128  ;;  %p1016_p8 = scmp.lt.s32.totalorder %s193_s10, %s193_s10 }
  0x23   : > { %p1009_p7 = scmp.ne.s32.totalorder %s193_s10, %s1008_s29  ;;  %p1017_p4 = scmp.lt.s32.totalorder %s1008_s29, %s1008_s29 }
  0x25   : > { %p1011_p9 = pnand %p1009_p7, %p997_p1  ;;  %p1018_p11 = por %p1017_p4, %p1016_p8 }
  0x27   : > { %p1012_p12 = pneg %p1011_p9 }
  0x29   : > { %p1019_p10 = pnand %p1018_p11, %p1012_p12 }
  0x2b   : > { %1022 = shalt.err (!%p1019_p10)
}
  0x2c   : > { %s1141_s9 = smov 64   ;;  %s1142_s12 = smov 4  }
  0x2d   : > { %918 = dma.hbm_to_vmem [thread:$0]  (!%p1244_p13), %s1425_s2, 128, %s193_s10, [#allocation3], %s1141_s9, %s1141_s9, %s1142_s12  }
  0x2e   : > { %s1023_s24 = scalar_lea.hbm %s1427_s4, 256 }
  0x2f   : > { %p1024_p0 = scmp.ne.s32.totalorder %s1427_s4, %s1023_s24  ;;  %p1030_p10 = scmp.lt.u32.totalorder %s1023_s24, %s1427_s4 }
  0x31   : > { %p1026_p4 = pnand %p1024_p0, %p997_p1 }
  0x33   : > { %p1027_p8 = pneg %p1026_p4 }
  0x35   : > { %p1032_p11 = pnand %p1030_p10, %p1027_p8 }
  0x37   : > { %1035 = shalt.err (!%p1032_p11)
}
  0x38   : > { %s1036_s10 = scalar_lea.vmem %s1248_s13, 256  ;;  %p1044_p6 = scmp.lt.s32.totalorder %s1248_s13, %s1248_s13 }
  0x39   : > { %p1037_p2 = scmp.ne.s32.totalorder %s1248_s13, %s1036_s10  ;;  %p1045_p7 = scmp.lt.s32.totalorder %s1036_s10, %s1036_s10 }
  0x3b   : > { %p1039_p3 = pnand %p1037_p2, %p997_p1  ;;  %p1046_p9 = por %p1045_p7, %p1044_p6 }
  0x3d   : > { %p1040_p5 = pneg %p1039_p3 }
  0x3f   : > { %p1047_p12 = pnand %p1046_p9, %p1040_p5 }
  0x41   : > { %1050 = shalt.err (!%p1047_p12)
}
  0x42   : > { %921 = dma.hbm_to_vmem [thread:$0]  (!%p1244_p13), %s1427_s4, 256, %s1248_s13, [#allocation6], %s1141_s9, %s1141_s9, %s1142_s12  }
  0x43   : > { %p1440_p0 = scmp.ne.s32.totalorder %s1437_s7, 0 }
  0x44   : > { %p1441_p4 = scmp.ne.s32.totalorder (!%p1440_p0), %s1438_s8, 0 }
  0x45   : > { %237 = sbr.rel (%p1440_p0) target bundleno = 1467 (0x5bb), region = 40 }
  0x4c   : > { %1104 = dma.done.wait (%p1441_p4), [#allocation3], 128  }
  0x4d   : > { %1106 = vsyncadd (%p1441_p4), [#allocation3], 4294967168 }
  0x4e   : > { %1108 = dma.done.wait (%p1441_p4), [#allocation6], 256  }
  0x4f   : > { %1110 = vsyncadd (%p1441_p4), [#allocation6], 4294967040  ;;  %p274_p1 = scmp.lt.s32.totalorder %s1129_s21, 1  ;;  %v1143_v0 = vmov 0   ;;  %v986_v7 = vld [vmem:[%s1424_s1] sm:$0xff]   ;;  %vm305_vm0 = vcmask 130048  }
  0x50   : > { %344 = vmatprep.mubr.bf16.mxu0 %v1143_v0  ;;  %420 = vmatprep.mubr.bf16.mxu1 %v1143_v0  ;;  %v987_v8 = vld [vmem:[%s1424_s1 + $0x8] sm:$0xff]   ;;  %v988_v29 = vld [vmem:[#allocation2] sm:$0xff]   ;;  %vm384_vm1 = vcmask 261120   ;;  %s904_s8 = sshll.u32 %s1129_s21, 8  ;;  %p1442_p8 = scmp.ne.s32.totalorder %s1435_s28, 0 }
  0x51   : > { %s275_s7 = scalar_select %p274_p1, %s1129_s21, 1  ;;  %v989_v40 = vld [vmem:[%s1426_s3] sm:$0xff]   ;;  %v990_v41 = vld [vmem:[%s1426_s3 + $0x8] sm:$0xff]  }
  0x52   : > { %v991_v62 = vld [vmem:[#allocation5] sm:$0xff]   ;;  %s1375_s17 = scalar_lea.hbm %s1428_s5, %s904_s8  ;;  %s1144_s25 = smov [#allocation7]  }
  0x53   : > { %s901_s11 = sshll.u32 %s275_s7, 5  ;;  %s1055_s27 = sshll.u32 %s1144_s25, 4  ;;  %s1056_s27 = int_to_ptr.vmem [resolvable:$false] %s1055_s27 }
  0x54   : > { %s281_s12 = scalar_lea.vmem %s1423_s0, %s901_s11  ;;  %s270_s11 = sand.u32 1, %s1121_s19  }
  0x55   : > { %v1314_v1 = vld [vmem:[%s281_s12 + $0x8] sm:$0xff]  ;;  %v1316_v2 = vld [vmem:[%s281_s12 + $0x18] sm:$0xff]  ;;  %v1318_v3 = vld [vmem:[%s281_s12] sm:$0xff]  ;;  %s869_s13 = sshll.u32 %s270_s11, 4  ;;  %s1377_s24 = scalar_lea.sflag [#allocation4], %s270_s11 }
  0x56   : > { %v290_v4 = vpack.c.bf16 %v1316_v2, %v1314_v1  ;;  %v1322_v5 = vld [vmem:[%s281_s12 + $0x10] sm:$0xff]  ;;  %s272_s9 = scalar_lea.vmem [#allocation7], %s869_s13  ;;  %s1057_s29 = scalar_lea.vmem %s1056_s27, 512 }
  0x57   : > { %v289_v6 = vpack.c.bf16 %v1322_v5, %v1318_v3  ;;  %s759_s12 = sshll.u32 %s272_s9, 4  ;;  %s1370_s12 = int_to_ptr.vmem [resolvable:$true] %s759_s12 }
  0x58   : > { %312 = vmatprep.subr.bf16.mxu0 %v290_v4  ;;  %s1051_s21 = scalar_lea.vmem %s1370_s12, 256  ;;  %p1058_p2 = scmp.lt.s32.totalorder %s1370_s12, %s1056_s27 }
  0x59   : > { %313 = vmatpush1.bf16.msra.mxu0 %v289_v6  ;;  %p1052_p13 = scmp.ne.s32.totalorder %s1370_s12, %s1051_s21  ;;  %p1059_p3 = scmp.lt.s32.totalorder %s1057_s29, %s1051_s21 }
  0x5b   : > { %p1053_p10 = pnand %p1052_p13, %p1442_p8  ;;  %p1060_p5 = por %p1059_p3, %p1058_p2 }
  0x5c   : > { %874 = vmatmul.mubr.msk.bf16.vlgmr.msra.gmra.mrb[0].mxu0 %vm305_vm0, %v986_v7 }
  0x5d   : > { %354 = vmatprep.mubr.bf16.mxu0 %v1143_v0  ;;  %p1054_p11 = pneg %p1053_p10 }
  0x5f   : > { %p1061_p6 = pnand %p1060_p5, %p1054_p11 }
  0x64   : > { %875 = vmatmul.mubr.msk.bf16.gmra.mrb[4].mxu0 %vm305_vm0, %v987_v8 }
  0x65   : > { %564 = vmatprep.mubr.bf16.mxu0 %v1143_v0 }
 0x12f   : > { %v346_v9 = vpop.f32.mrb[0].mxu0 }
 0x130   : > { %v348_v10 = vpop.f32.mrb[1].mxu0  ;;  %v365_v12 = vmax.f32 %v346_v9, 0.0 }
 0x131   : > { %v350_v11 = vpop.f32.mrb[2].mxu0  ;;  %v366_v15 = vmax.f32 %v348_v10, 0.0 }
 0x132   : > { %v367_v13 = vmax.f32 %v350_v11, 0.0  ;;  %v352_v14 = vpop.f32.mrb[3].mxu0 }
 0x133   : > { %v368_v16 = vmax.f32 %v352_v14, 0.0 }
 0x134   : > { %v375_v17 = vpack.c.bf16 %v367_v13, %v365_v12 }
 0x135   : > { %v376_v18 = vpack.c.bf16 %v368_v16, %v366_v15 }
 0x137   : > { %v356_v19 = vpop.f32.mrb[4].mxu0  ;;  %388 = vmatprep.subr.bf16.mxu1 %v376_v18  ;;  %v992_v18 = vld [vmem:[%s1426_s3 + $0x10] sm:$0xff]  }
 0x138   : > { %v358_v20 = vpop.f32.mrb[5].mxu0  ;;  %389 = vmatpush1.bf16.msra.mxu1 %v375_v17  ;;  %v369_v22 = vmax.f32 %v356_v19, 0.0 }
 0x139   : > { %v360_v21 = vpop.f32.mrb[6].mxu0  ;;  %v370_v25 = vmax.f32 %v358_v20, 0.0 }
 0x13a   : > { %v371_v23 = vmax.f32 %v360_v21, 0.0  ;;  %v362_v24 = vpop.f32.mrb[7].mxu0 }
 0x13b   : > { %v372_v26 = vmax.f32 %v362_v24, 0.0 }
 0x13c   : > { %v377_v27 = vpack.c.bf16 %v371_v23, %v369_v22 }
 0x13d   : > { %v378_v28 = vpack.c.bf16 %v372_v26, %v370_v25 }
 0x13f   : > { %390 = vmatprep.subr.bf16.mxu1 %v378_v28 }
 0x140   : > { %391 = vmatpush1.bf16.msra.mxu1 %v377_v27 }
 0x143   : > { %877 = vmatmul.mubr.msk.bf16.vlgmr.msra.gmra.mrb[0].mxu1 %vm384_vm1, %v988_v29 }
 0x144   : > { %489 = vmatprep.mubr.bf16.mxu1 %v1143_v0 }
 0x216   : > { %v422_v30 = vpop.f32.mrb[0].mxu1 }
 0x217   : > { %v424_v31 = vpop.f32.mrb[1].mxu1  ;;  %v431_v33 = vsub.f32 %v1318_v3, %v422_v30 }
 0x218   : > { %v426_v32 = vpop.f32.mrb[2].mxu1  ;;  %v432_v36 = vsub.f32 %v1314_v1, %v424_v31 }
 0x219   : > { %v433_v34 = vsub.f32 %v1322_v5, %v426_v32  ;;  %v428_v35 = vpop.f32.mrb[3].mxu1 }
 0x21a   : > { %v434_v37 = vsub.f32 %v1316_v2, %v428_v35 }
 0x21b   : > { %v435_v38 = vpack.c.bf16 %v433_v34, %v431_v33 }
 0x21c   : > { %v436_v39 = vpack.c.bf16 %v434_v37, %v432_v36 }
 0x21e   : > { %457 = vmatprep.subr.bf16.mxu1 %v436_v39 }
 0x21f   : > { %458 = vmatpush1.bf16.msra.mxu1 %v435_v38 }
 0x222   : > { %880 = vmatmul.mubr.msk.bf16.vlgmr.msra.gmra.mrb[4].mxu1 %vm305_vm0, %v989_v40 }
 0x223   : > { %499 = vmatprep.mubr.bf16.mxu1 %v1143_v0 }
 0x22a   : > { %881 = vmatmul.mubr.msk.bf16.gmra.mrb[8].mxu1 %vm305_vm0, %v990_v41 }
 0x22b   : > { %714 = vmatprep.mubr.bf16.mxu1 %v1143_v0 }
 0x2f5   : > { %v491_v42 = vpop.f32.mrb[4].mxu1 }
 0x2f6   : > { %v493_v43 = vpop.f32.mrb[5].mxu1  ;;  %v510_v45 = vmax.f32 %v491_v42, 0.0 }
 0x2f7   : > { %v495_v44 = vpop.f32.mrb[6].mxu1  ;;  %v511_v48 = vmax.f32 %v493_v43, 0.0 }
 0x2f8   : > { %v512_v46 = vmax.f32 %v495_v44, 0.0  ;;  %v497_v47 = vpop.f32.mrb[7].mxu1 }
 0x2f9   : > { %v513_v49 = vmax.f32 %v497_v47, 0.0 }
 0x2fa   : > { %v520_v50 = vpack.c.bf16 %v512_v46, %v510_v45 }
 0x2fb   : > { %v521_v51 = vpack.c.bf16 %v513_v49, %v511_v48 }
 0x2fd   : > { %v501_v52 = vpop.f32.mrb[8].mxu1  ;;  %532 = vmatprep.subr.bf16.mxu0 %v521_v51 }
 0x2fe   : > { %v503_v53 = vpop.f32.mrb[9].mxu1  ;;  %533 = vmatpush1.bf16.msra.mxu0 %v520_v50  ;;  %v514_v55 = vmax.f32 %v501_v52, 0.0 }
 0x2ff   : > { %v505_v54 = vpop.f32.mrb[10].mxu1  ;;  %v515_v58 = vmax.f32 %v503_v53, 0.0 }
 0x300   : > { %v516_v56 = vmax.f32 %v505_v54, 0.0  ;;  %v507_v57 = vpop.f32.mrb[11].mxu1 }
 0x301   : > { %v517_v59 = vmax.f32 %v507_v57, 0.0 }
 0x302   : > { %v522_v60 = vpack.c.bf16 %v516_v56, %v514_v55 }
 0x303   : > { %v523_v61 = vpack.c.bf16 %v517_v59, %v515_v58 }
 0x305   : > { %534 = vmatprep.subr.bf16.mxu0 %v523_v61 }
 0x306   : > { %535 = vmatpush1.bf16.msra.mxu0 %v522_v60 }
 0x309   : > { %883 = vmatmul.mubr.msk.bf16.vlgmr.msra.gmra.mrb[8].mxu0 %vm384_vm1, %v991_v62 }
 0x30a   : > { %638 = vmatprep.mubr.bf16.mxu0 %v1143_v0 }
 0x3dc   : > { %v566_v63 = vpop.f32.mrb[8].mxu0 }
 0x3dd   : > { %v575_v4 = vadd.f32 %v566_v63, %v422_v30  ;;  %v568_v6 = vpop.f32.mrb[9].mxu0 }
 0x3de   : > { %v576_v7 = vadd.f32 %v568_v6, %v424_v31  ;;  %v570_v8 = vpop.f32.mrb[10].mxu0 }
 0x3df   : > { %v577_v9 = vadd.f32 %v570_v8, %v426_v32  ;;  %v572_v10 = vpop.f32.mrb[11].mxu0  ;;  %v579_v15 = vsub.f32 %v1318_v3, %v575_v4 }
 0x3e0   : > { %v578_v11 = vadd.f32 %v572_v10, %v428_v35  ;;  %v580_v13 = vsub.f32 %v1314_v1, %v576_v7  ;;  %v993_v1 = vld [vmem:[%s1426_s3 + $0x18] sm:$0xff]   ;;  %v994_v35 = vld [vmem:[#allocation5 + $0x8] sm:$0xff]  }
 0x3e1   : > { %v581_v12 = vsub.f32 %v1322_v5, %v577_v9 }
 0x3e2   : > { %v582_v14 = vsub.f32 %v1316_v2, %v578_v11 }
 0x3e3   : > { %v583_v17 = vpack.c.bf16 %v581_v12, %v579_v15 }
 0x3e4   : > { %v584_v16 = vpack.c.bf16 %v582_v14, %v580_v13 }
 0x3e6   : > { %606 = vmatprep.subr.bf16.mxu0 %v584_v16 }
 0x3e7   : > { %607 = vmatpush1.bf16.msra.mxu0 %v583_v17 }
 0x3ea   : > { %890 = vmatmul.mubr.msk.bf16.vlgmr.msra.gmra.mrb[12].mxu0 %vm305_vm0, %v992_v18 }
 0x3eb   : > { %648 = vmatprep.mubr.bf16.mxu0 %v1143_v0 }
 0x3f2   : > { %891 = vmatmul.mubr.msk.bf16.gmra.mrb[16].mxu0 %vm305_vm0, %v993_v1 }
 0x4bd   : > { %v640_v2 = vpop.f32.mrb[12].mxu0 }
 0x4be   : > { %v642_v3 = vpop.f32.mrb[13].mxu0  ;;  %v659_v19 = vmax.f32 %v640_v2, 0.0 }
 0x4bf   : > { %v644_v5 = vpop.f32.mrb[14].mxu0  ;;  %v660_v22 = vmax.f32 %v642_v3, 0.0 }
 0x4c0   : > { %v661_v20 = vmax.f32 %v644_v5, 0.0  ;;  %v646_v21 = vpop.f32.mrb[15].mxu0 }
 0x4c1   : > { %v662_v23 = vmax.f32 %v646_v21, 0.0 }
 0x4c2   : > { %v670_v24 = vpack.c.bf16 %v661_v20, %v659_v19 }
 0x4c3   : > { %v671_v25 = vpack.c.bf16 %v662_v23, %v660_v22 }
 0x4c5   : > { %v650_v26 = vpop.f32.mrb[16].mxu0  ;;  %682 = vmatprep.subr.bf16.mxu1 %v671_v25 }
 0x4c6   : > { %v652_v0 = vpop.f32.mrb[17].mxu0  ;;  %683 = vmatpush1.bf16.msra.mxu1 %v670_v24  ;;  %v663_v28 = vmax.f32 %v650_v26, 0.0 }
 0x4c7   : > { %v654_v27 = vpop.f32.mrb[18].mxu0  ;;  %v664_v31 = vmax.f32 %v652_v0, 0.0 }
 0x4c8   : > { %v665_v29 = vmax.f32 %v654_v27, 0.0  ;;  %v656_v30 = vpop.f32.mrb[19].mxu0 }
 0x4c9   : > { %v666_v32 = vmax.f32 %v656_v30, 0.0 }
 0x4ca   : > { %v672_v33 = vpack.c.bf16 %v665_v29, %v663_v28 }
 0x4cb   : > { %v673_v34 = vpack.c.bf16 %v666_v32, %v664_v31 }
 0x4cd   : > { %684 = vmatprep.subr.bf16.mxu1 %v673_v34 }
 0x4ce   : > { %685 = vmatpush1.bf16.msra.mxu1 %v672_v33 }
 0x4d1   : > { %893 = vmatmul.mubr.msk.bf16.vlgmr.msra.gmra.mrb[12].mxu1 %vm384_vm1, %v994_v35 }
 0x5a4   : > { %v716_v36 = vpop.f32.mrb[12].mxu1 }
 0x5a5   : > { %v725_v37 = vadd.f32 %v716_v36, %v575_v4  ;;  %v718_v38 = vpop.f32.mrb[13].mxu1 }
 0x5a6   : > { %v726_v39 = vadd.f32 %v718_v38, %v576_v7  ;;  %v720_v40 = vpop.f32.mrb[14].mxu1 }
 0x5a7   : > { %v727_v41 = vadd.f32 %v720_v40, %v577_v9  ;;  %v722_v42 = vpop.f32.mrb[15].mxu1 }
 0x5a8   : > { %v902_v43 = vpack.c.bf16 %v726_v39, %v725_v37  ;;  %v728_v44 = vadd.f32 %v722_v42, %v578_v11 }
 0x5aa   : > { %741 = vst [vmem:[%s272_s9] sm:$0xff] %v902_v43  ;;  %v903_v45 = vpack.c.bf16 %v728_v44, %v727_v41 }
 0x5ac   : > { %742 = vst [vmem:[%s272_s9 + $0x8] sm:$0xff] %v903_v45 }
 0x5ad   : > { %1064 = shalt.err (!%p1061_p6)
}
 0x5ae   : > { %s1065_s10 = scalar_lea.hbm %s1375_s17, 256  ;;  %s1069_s7 = scalar_lea.hbm %s1428_s5, 512 }
 0x5af   : > { %p1066_p7 = scmp.ne.s32.totalorder %s1375_s17, %s1065_s10  ;;  %p1070_p0 = scmp.lt.u32.totalorder %s1375_s17, %s1428_s5 }
 0x5b0   : > { %p1071_p4 = scmp.lt.u32.totalorder %s1069_s7, %s1065_s10  ;;  %p1073_p13 = scmp.lt.u32.totalorder %s1065_s10, %s1375_s17 }
 0x5b1   : > { %p1067_p9 = pnand %p1066_p7, %p1442_p8 }
 0x5b2   : > { %p1072_p1 = por %p1071_p4, %p1070_p0 }
 0x5b3   : > { %p1068_p12 = pneg %p1067_p9 }
 0x5b4   : > { %p1074_p10 = por %p1073_p13, %p1072_p1 }
 0x5b6   : > { %p1075_p11 = pnand %p1074_p10, %p1068_p12 }
 0x5b8   : > { %1078 = shalt.err (!%p1075_p11)
}
 0x5b9   : > { %s1145_s9 = smov 128   ;;  %s1146_s8 = smov 8  }
 0x5ba   : > { %913 = dma.vmem_to_hbm [thread:$0]  (%p1442_p8), %s1370_s12, 256, %s1375_s17, %s1377_s24, %s1145_s9, %s1145_s9, %s1146_s8  }
 0x5bb PF: > { %p930_p2 = scmp.ge.s32.totalorder %s1137_s23, 2  ;;  %s774_s15 = sand.u32 1, %s1117_s18  }
 0x5bc   : > { %p1443_p3 = scmp.ne.s32.totalorder %s1436_s30, 0  ;;  %s775_s16 = scalar_lea.sflag [#allocation4], %s774_s15 }
 0x5be   : > { %p923_p5 = pnand %p930_p2, %p1443_p3 }
 0x5c0   : > { %1112 = dma.done.wait (!%p923_p5), %s775_s16, 256  }
 0x5c1   : > { %1114 = vsyncadd (!%p923_p5), %s775_s16, 4294967040  ;;  %s20_s23 = sadd.s32 1, %s1137_s23   ;;  %s1444_s28 = sld [smem:[#allocation11_spill]] }
 0x5c2   : > { %p17_p6 = scmp.ge.s32.totalorder %s20_s23, 4   ;;  %s1445_s18 = smov %s1121_s19 }
 0x5c3   : > { %s1446_s19 = smov %s1125_s20  ;;  %s1447_s20 = smov %s1230_s6 }
 0x5c4   : > { %s1448_s21 = smov %s1133_s22  ;;  %19 = sbr.rel (!%p17_p6) target bundleno = 6 (0x6), region = 86 }
 0x5c7   : > { %s1449_s22 = smov %s1444_s28 }
 0x5cb   :  { %780 = vsyncpa [#allocation3], 1 }
 0x5cc   :  { %782 = vsyncpa [#allocation3 + $0x1], 1 }
 0x5cd   :  { %783 = vsyncpa [#allocation6], 1 }
 0x5ce   :  { %784 = vsyncpa [#allocation4], 1 }
 0x5cf   :  { %786 = vsyncpa [#allocation4 + $0x1], 1 }

</bundles_post_ra>
